<compile_context>
chip_gen: v5e
topology: v5e:2x2
jax: 0.10.0
libtpu: 0.0.40
codegen_flags: <defaults>
</compile_context>

<pallas_src>
import functools

import jax
import jax.numpy as jnp
from jax.experimental import pallas as pl
from jax.experimental.pallas import tpu as pltpu

HIDDEN = 32
VMEM_LIMIT_BYTES = 48 * 1024 * 1024   # raised scoped limit; < v7x's 64 MiB/TC physical
VMEM_BUDGET_BYTES = 40 * 1024 * 1024  # live-set budget used to clamp the batch tile


def mlp_kernel(x_ref, w1_ref, b1_ref, w2_ref, b2_ref, w3_ref, b3_ref, o_ref):
    # x_ref: (state_p, TB) bf16 ; wN_ref: (out, in) bf16 ; bN_ref: (out, 1) f32
    x = x_ref[...]
    # Layer 1: (32, state_p) @ (state_p, TB) -> (32, TB), f32 accumulate on MXU.
    h1 = jnp.dot(w1_ref[...], x, preferred_element_type=jnp.float32)
    h1 = jnp.maximum(h1 + b1_ref[...], 0.0)
    # Layer 2: (32, 32) @ (32, TB) -> (32, TB)
    h2 = jnp.dot(w2_ref[...], h1.astype(w2_ref.dtype),
                 preferred_element_type=jnp.float32)
    h2 = jnp.maximum(h2 + b2_ref[...], 0.0)
    # Layer 3 (no activation): (action, 32) @ (32, TB) -> (action, TB)
    o = jnp.dot(w3_ref[...], h2.astype(w3_ref.dtype),
                preferred_element_type=jnp.float32) + b3_ref[...]
    o_ref[...] = o.astype(o_ref.dtype)


def _round_up(n, m):
    return ((n + m - 1) // m) * m


def _choose_tile(batch, state_p, action, tile_cap):
    """Pick (padded_batch, tile) balancing per-step overhead, VMEM, tail padding."""
    # Approximate live VMEM per batch sample:
    #   x stream (2 bufs, bf16) + out stream (2 bufs, f32, sublane-padded to 8)
    #   + h1/h2 intermediates in f32 and their bf16 casts.
    bytes_per_sample = (2 * 2 * state_p
                        + 2 * 4 * _round_up(action, 8)
                        + (4 + 2) * 2 * HIDDEN)
    vmem_cap = max(128, (VMEM_BUDGET_BYTES // bytes_per_sample) // 128 * 128)
    cap = max(128, min(tile_cap, vmem_cap))
    n_tiles = max(1, -(-batch // cap))
    if batch >= 4096:
        # Keep >=2 grid steps so v7x's second TensorCore has work (parallel axis).
        n_tiles = max(n_tiles, 2)
    tb = _round_up(-(-batch // n_tiles), 128)   # balanced tiles -> minimal padding
    return n_tiles * tb, tb


@functools.partial(
    jax.jit, static_argnames=("tile_batch", "out_dtype", "feature_major_output"))
def mymodel_forward(x, params, *, tile_batch=32768, out_dtype=jnp.float32,
                    feature_major_output=False):
    """x: (batch, state) f32.  params in PyTorch convention: w (out, in), b (out,).

    Returns (batch, action) in `out_dtype` (default f32, matching nn.Sequential),
    or (action, batch) if feature_major_output=True (lets downstream argmax over
    axis 0 skip the output transpose pass).
    """
    w1, b1 = params["w1"], params["b1"]     # (32, state), (32,)
    w2, b2 = params["w2"], params["b2"]     # (32, 32),    (32,)
    w3, b3 = params["w3"], params["b3"]     # (action,32), (action,)
    batch, state = x.shape
    action = w3.shape[0]

    state_p = _round_up(state, 16)          # bf16 sublane tile = 16 rows -> dense DMA
    padded, tb = _choose_tile(batch, state_p, action, tile_batch)
    grid = (padded // tb,)

    # Wrapper-side layout plumbing: single fused XLA pass (pad batch+state,
    # transpose to feature-major, cast matmul inputs to bf16).
    # TODO(synk): a producer that already emits feature-major bf16 (state, batch)
    # activations (and a consumer taking (action, batch)) could skip these passes
    # entirely and cut end-to-end HBM traffic ~2x; default path keeps PyTorch parity.
    xt = jnp.pad(x, ((0, padded - batch), (0, state_p - state))).T.astype(jnp.bfloat16)
    w1b = jnp.pad(w1, ((0, 0), (0, state_p - state))).astype(jnp.bfloat16)
    w2b, w3b = (w.astype(jnp.bfloat16) for w in (w2, w3))
    b1c, b2c, b3c = (b.astype(jnp.float32).reshape(-1, 1) for b in (b1, b2, b3))

    const = lambda a: pl.BlockSpec(a.shape, lambda i: (0, 0))
    cost = pl.CostEstimate(
        flops=2 * padded * (state_p * HIDDEN + HIDDEN * HIDDEN + HIDDEN * action),
        transcendentals=0,
        bytes_accessed=(xt.size * 2
                        + padded * action * jnp.dtype(out_dtype).itemsize
                        + (w1b.size + w2b.size + w3b.size) * 2
                        + (b1c.size + b2c.size + b3c.size) * 4),
    )

    out_t = pl.pallas_call(
        mlp_kernel,
        out_shape=jax.ShapeDtypeStruct((action, padded), out_dtype),
        grid_spec=pltpu.PrefetchScalarGridSpec(
            num_scalar_prefetch=0,
            grid=grid,
            in_specs=[
                pl.BlockSpec((state_p, tb), lambda i: (0, i)),   # x stream (pipelined)
                const(w1b), const(b1c),                          # VMEM-resident params
                const(w2b), const(b2c),
                const(w3b), const(b3c),
            ],
            out_specs=pl.BlockSpec((action, tb), lambda i: (0, i)),  # lane-dense store
        ),
        compiler_params=pltpu.CompilerParams(
            dimension_semantics=("parallel",),        # shards across v7x's 2 TCs
            vmem_limit_bytes=VMEM_LIMIT_BYTES),       # big tiles need > default scoped
        cost_estimate=cost,
    )(xt, w1b, b1c, w2b, b2c, w3b, b3c)

    if feature_major_output:
        return out_t[:, :batch]          # (action, batch); argmax over axis 0 downstream
    return out_t[:, :batch].T            # PyTorch parity: (batch, action)


def init_params(key, state_size, action_size, hidden=HIDDEN):
    """Deterministic init matching nn.Linear shapes (PyTorch (out, in) layout)."""
    ks = jax.random.split(key, 6)

    def lin(kw, kb, fan_in, fan_out):
        bound = 1.0 / (fan_in ** 0.5)
        w = jax.random.uniform(kw, (fan_out, fan_in), jnp.float32, -bound, bound)
        b = jax.random.uniform(kb, (fan_out,), jnp.float32, -bound, bound)
        return w, b

    w1, b1 = lin(ks[0], ks[1], state_size, hidden)
    w2, b2 = lin(ks[2], ks[3], hidden, hidden)
    w3, b3 = lin(ks[4], ks[5], hidden, action_size)
    return {"w1": w1, "b1": b1, "w2": w2, "b2": b2, "w3": w3, "b3": b3}


def _reference(x, params):
    # Same math in plain JAX with the same bf16 rounding of the matmul inputs
    # (f32 accumulate), so tolerances stay tight.
    def bf(a):
        return a.astype(jnp.bfloat16).astype(jnp.float32)

    h = jnp.maximum(bf(x) @ bf(params["w1"]).T + params["b1"], 0.0)
    h = jnp.maximum(bf(h) @ bf(params["w2"]).T + params["b2"], 0.0)
    return bf(h) @ bf(params["w3"]).T + params["b3"]


if __name__ == "__main__":
    key = jax.random.PRNGKey(0)
    state_size, action_size, batch = 8, 4, 2

    k_params, k_x, k_x2 = jax.random.split(key, 3)
    params = init_params(k_params, state_size, action_size)
    x = jax.random.normal(k_x, (batch, state_size), jnp.float32)

    out = jax.block_until_ready(mymodel_forward(x, params))
    assert out.shape == (batch, action_size)
    assert jnp.allclose(out, _reference(x, params), atol=1e-4, rtol=1e-4)

    # Second small check exercising batch padding / tail handling.
    x2 = jax.random.normal(k_x2, (200, state_size), jnp.float32)
    out2 = jax.block_until_ready(mymodel_forward(x2, params))
    assert out2.shape == (200, action_size)
    assert jnp.allclose(out2, _reference(x2, params), atol=1e-4, rtol=1e-4)

    # TODO(synk): select_action (eval/train toggle + argmax policy helper) is
    # host-side logic, not part of forward; use
    # jnp.argmax(mymodel_forward(s, p, feature_major_output=True), axis=0).
    print("KERNEL_OK")
</pallas_src>

<mosaic_0001>
module attributes {stable_mosaic.version = 11 : i64} {
  func.func @mlp_kernel(%arg0: i32, %arg1: memref<16x128xbf16, #tpu.memory_space<vmem>>, %arg2: memref<32x16xbf16, #tpu.memory_space<vmem>>, %arg3: memref<32x1xf32, #tpu.memory_space<vmem>>, %arg4: memref<32x32xbf16, #tpu.memory_space<vmem>>, %arg5: memref<32x1xf32, #tpu.memory_space<vmem>>, %arg6: memref<4x32xbf16, #tpu.memory_space<vmem>>, %arg7: memref<4x1xf32, #tpu.memory_space<vmem>>, %arg8: memref<4x128xf32, #tpu.memory_space<vmem>>) attributes {dimension_semantics = [#tpu.dimension_semantics<parallel>], iteration_bounds = array<i64: 1>, scalar_prefetch = 0 : i64, scratch_operands = 0 : i64, tpu.core_type = #tpu.core_type<tc>, window_params = [{transform_indices = @transform_0, window_bounds = array<i64: 16, 128>}, {pipeline_mode = #tpu.pipeline_mode<synchronous>, transform_indices = @transform_1, window_bounds = array<i64: 32, 16>}, {pipeline_mode = #tpu.pipeline_mode<synchronous>, transform_indices = @transform_2, window_bounds = array<i64: 32, 1>}, {pipeline_mode = #tpu.pipeline_mode<synchronous>, transform_indices = @transform_3, window_bounds = array<i64: 32, 32>}, {pipeline_mode = #tpu.pipeline_mode<synchronous>, transform_indices = @transform_4, window_bounds = array<i64: 32, 1>}, {pipeline_mode = #tpu.pipeline_mode<synchronous>, transform_indices = @transform_5, window_bounds = array<i64: 4, 32>}, {pipeline_mode = #tpu.pipeline_mode<synchronous>, transform_indices = @transform_6, window_bounds = array<i64: 4, 1>}, {transform_indices = @transform_7, window_bounds = array<i64: 4, 128>}]} {
    %c0 = arith.constant 0 : index
    %c0_0 = arith.constant 0 : index
    %0 = vector.load %arg1[%c0, %c0_0] : memref<16x128xbf16, #tpu.memory_space<vmem>>, vector<16x128xbf16>
    %c0_1 = arith.constant 0 : index
    %c0_2 = arith.constant 0 : index
    %1 = vector.load %arg2[%c0_1, %c0_2] : memref<32x16xbf16, #tpu.memory_space<vmem>>, vector<32x16xbf16>
    %cst = arith.constant dense<0.000000e+00> : vector<32x128xf32>
    %2 = tpu.matmul %1, %0, %cst {dimension_numbers = #tpu.dot_dimension_numbers<[1], [0], [0], [1], [0, 0, 1, 1], [], []>} : vector<32x16xbf16>, vector<16x128xbf16>, vector<32x128xf32> -> vector<32x128xf32>
    %c0_3 = arith.constant 0 : index
    %c0_4 = arith.constant 0 : index
    %3 = vector.load %arg3[%c0_3, %c0_4] : memref<32x1xf32, #tpu.memory_space<vmem>>, vector<32x1xf32>
    %4 = vector.broadcast %3 : vector<32x1xf32> to vector<32x128xf32>
    %5 = arith.addf %2, %4 : vector<32x128xf32>
    %cst_5 = arith.constant 0.000000e+00 : f32
    %6 = vector.broadcast %cst_5 : f32 to vector<32x128xf32>
    %7 = arith.maximumf %5, %6 : vector<32x128xf32>
    %c0_6 = arith.constant 0 : index
    %c0_7 = arith.constant 0 : index
    %8 = vector.load %arg4[%c0_6, %c0_7] : memref<32x32xbf16, #tpu.memory_space<vmem>>, vector<32x32xbf16>
    %9 = arith.truncf %7 : vector<32x128xf32> to vector<32x128xbf16>
    %cst_8 = arith.constant dense<0.000000e+00> : vector<32x128xf32>
    %10 = tpu.matmul %8, %9, %cst_8 {dimension_numbers = #tpu.dot_dimension_numbers<[1], [0], [0], [1], [0, 0, 1, 1], [], []>} : vector<32x32xbf16>, vector<32x128xbf16>, vector<32x128xf32> -> vector<32x128xf32>
    %c0_9 = arith.constant 0 : index
    %c0_10 = arith.constant 0 : index
    %11 = vector.load %arg5[%c0_9, %c0_10] : memref<32x1xf32, #tpu.memory_space<vmem>>, vector<32x1xf32>
    %12 = vector.broadcast %11 : vector<32x1xf32> to vector<32x128xf32>
    %13 = arith.addf %10, %12 : vector<32x128xf32>
    %cst_11 = arith.constant 0.000000e+00 : f32
    %14 = vector.broadcast %cst_11 : f32 to vector<32x128xf32>
    %15 = arith.maximumf %13, %14 : vector<32x128xf32>
    %c0_12 = arith.constant 0 : index
    %c0_13 = arith.constant 0 : index
    %16 = vector.load %arg6[%c0_12, %c0_13] : memref<4x32xbf16, #tpu.memory_space<vmem>>, vector<4x32xbf16>
    %17 = arith.truncf %15 : vector<32x128xf32> to vector<32x128xbf16>
    %cst_14 = arith.constant dense<0.000000e+00> : vector<4x128xf32>
    %18 = tpu.matmul %16, %17, %cst_14 {dimension_numbers = #tpu.dot_dimension_numbers<[1], [0], [0], [1], [0, 0, 1, 1], [], []>} : vector<4x32xbf16>, vector<32x128xbf16>, vector<4x128xf32> -> vector<4x128xf32>
    %c0_15 = arith.constant 0 : index
    %c0_16 = arith.constant 0 : index
    %19 = vector.load %arg7[%c0_15, %c0_16] : memref<4x1xf32, #tpu.memory_space<vmem>>, vector<4x1xf32>
    %20 = vector.broadcast %19 : vector<4x1xf32> to vector<4x128xf32>
    %21 = arith.addf %18, %20 : vector<4x128xf32>
    %c0_17 = arith.constant 0 : index
    %c0_18 = arith.constant 0 : index
    %22 = vector.load %arg8[%c0_17, %c0_18] : memref<4x128xf32, #tpu.memory_space<vmem>>, vector<4x128xf32>
    tpu.vector_store %arg8[%c0_17, %c0_18], %21 {strides = array<i32>} : memref<4x128xf32, #tpu.memory_space<vmem>>, vector<4x128xf32>,
    return
  }
  func.func @transform_0(%arg0: i32) -> (i32, i32) {
    %c0_i32 = arith.constant 0 : i32
    %c0_i32_0 = arith.constant 0 : i32
    return %c0_i32, %arg0 : i32, i32
  }
  func.func @transform_1(%arg0: i32) -> (i32, i32) {
    %c0_i32 = arith.constant 0 : i32
    %c0_i32_0 = arith.constant 0 : i32
    %c0_i32_1 = arith.constant 0 : i32
    return %c0_i32, %c0_i32_0 : i32, i32
  }
  func.func @transform_2(%arg0: i32) -> (i32, i32) {
    %c0_i32 = arith.constant 0 : i32
    %c0_i32_0 = arith.constant 0 : i32
    %c0_i32_1 = arith.constant 0 : i32
    return %c0_i32, %c0_i32_0 : i32, i32
  }
  func.func @transform_3(%arg0: i32) -> (i32, i32) {
    %c0_i32 = arith.constant 0 : i32
    %c0_i32_0 = arith.constant 0 : i32
    %c0_i32_1 = arith.constant 0 : i32
    return %c0_i32, %c0_i32_0 : i32, i32
  }
  func.func @transform_4(%arg0: i32) -> (i32, i32) {
    %c0_i32 = arith.constant 0 : i32
    %c0_i32_0 = arith.constant 0 : i32
    %c0_i32_1 = arith.constant 0 : i32
    return %c0_i32, %c0_i32_0 : i32, i32
  }
  func.func @transform_5(%arg0: i32) -> (i32, i32) {
    %c0_i32 = arith.constant 0 : i32
    %c0_i32_0 = arith.constant 0 : i32
    %c0_i32_1 = arith.constant 0 : i32
    return %c0_i32, %c0_i32_0 : i32, i32
  }
  func.func @transform_6(%arg0: i32) -> (i32, i32) {
    %c0_i32 = arith.constant 0 : i32
    %c0_i32_0 = arith.constant 0 : i32
    %c0_i32_1 = arith.constant 0 : i32
    return %c0_i32, %c0_i32_0 : i32, i32
  }
  func.func @transform_7(%arg0: i32) -> (i32, i32) {
    %c0_i32 = arith.constant 0 : i32
    %c0_i32_0 = arith.constant 0 : i32
    return %c0_i32, %arg0 : i32, i32
  }
}

</mosaic_0001>

<bundles_post_ra>
// kernel: mymodel_forward.1
= control target key start
LH: loop header
LB: loop body
LE: loop exit
PB: predicated region body
PF: predicated region fallthrough
CT: control target
= control target key end

     0   :  { %v239_v1 = vmov 0   ;;  %vm73_vm0 = vcmask 130048   ;;  %vm143_vm1 = vcmask 261120   ;;  %s331_s0 = inlined_call_operand.vmem [shape: bf16[16,128], index: 0, kind: input, shape index: {}]   ;;  %s332_s1 = inlined_call_operand.vmem [shape: bf16[32,16], index: 1, kind: input, shape index: {}]   ;;  %s333_s2 = inlined_call_operand.vmem [shape: f32[32,1], index: 2, kind: input, shape index: {}]   ;;  %s334_s4 = inlined_call_operand.vmem [shape: f32[32,1], index: 4, kind: input, shape index: {}]   ;;  %s335_s6 = inlined_call_operand.vmem [shape: f32[4,1], index: 6, kind: input, shape index: {}]   ;;  %s336_s3 = inlined_call_operand.vmem [shape: bf16[32,32], index: 3, kind: input, shape index: {}]   ;;  %s337_s5 = inlined_call_operand.vmem [shape: bf16[4,32], index: 5, kind: input, shape index: {}]   ;;  %s338_s7 = inlined_call_operand.vmem [shape: f32[4,128], index: 7, kind: output, shape index: {}]  }
   0x1   :  { %v228_v0 = vld [vmem:[%s331_s0] sm:$0xff]  ;;  %237 = vset.pattern.permute.xlu1 %v239_v1  ;;  %236 = vset.pattern.permute.xlu0 %v239_v1  ;;  %v35_v2 = vld [vmem:[%s333_s2 + $0x10] sm:$0xff]  ;;  %v36_v5 = vld [vmem:[%s333_s2 + $0x18] sm:$0xff] }
   0x2   :  { %v229_v3 = vld [vmem:[%s332_s1] sm:$0xff]  ;;  %49 = vperm.xlu0 %236, %v35_v2   ;;  %238 = vset.pattern.permute.xlu2 %v239_v1  ;;  %v34_v6 = vld [vmem:[%s333_s2 + $0x8] sm:$0xff]  ;;  %v111_v11 = vld [vmem:[%s334_s4 + $0x10] sm:$0xff] }
   0x3   :  { %v33_v4 = vld [vmem:[%s333_s2] sm:$0xff]  ;;  %87 = vmatpush.bf16.msra.mxu0 %v228_v0  ;;  %v110_v8 = vld [vmem:[%s334_s4 + $0x8] sm:$0xff]  ;;  %125 = vperm.xlu2 %238, %v111_v11   ;;  %v112_v14 = vld [vmem:[%s334_s4 + $0x18] sm:$0xff] }
   0x4   :  { %39 = vperm.xlu1 %237, %v33_v4   ;;  %v109_v7 = vld [vmem:[%s334_s4] sm:$0xff]  ;;  %v230_v9 = vld [vmem:[%s332_s1 + $0x8] sm:$0xff] }
   0x5   :  { %v176_v17 = vld [vmem:[%s335_s6] sm:$0xf]  ;;  %v232_v32 = vld [vmem:[%s336_s3 + $0x8] sm:$0xff] }
   0x6   :  { %215 = vmatmul.msk.bf16.vlgmr.msra.gmra.mxu0 %vm73_vm0, %v229_v3  ;;  %v231_v31 = vld [vmem:[%s336_s3] sm:$0xff] }
   0x7   :  { %v173_v51 = vld [vmem:[%s337_s5] sm:$0x3] }
   0xa   :  { %54 = vperm.xlu0 %236, %v36_v5  }
   0xb   :  { %130 = vperm.xlu2 %238, %v112_v14  }
   0xc   :  { %44 = vperm.xlu1 %237, %v34_v6  }
  0x12   :  { %115 = vperm.xlu0 %236, %v109_v7  }
  0x13   :  { %179 = vperm.xlu2 %238, %v176_v17  }
  0x14   :  { %120 = vperm.xlu1 %237, %v110_v8  }
  0x16   :  { %216 = vmatmul.msk.bf16.gmra.mxu0 %vm73_vm0, %v230_v9 }
  0x5d   :  { %v126_v34 = vpop.permute.xlu2 %125 }
  0x65   :  { %v131_v39 = vpop.permute.xlu2 %130 }
  0x6d   :  { %v180_v52 = vpop.permute.xlu2 %179 }
  0x74   :  { %v50_v15 = vpop.permute.xlu0 %49 }
  0x76   :  { %v40_v13 = vpop.permute.xlu1 %39 }
  0x7c   :  { %v55_v20 = vpop.permute.xlu0 %54 }
  0x7e   :  { %v45_v18 = vpop.permute.xlu1 %44 }
  0x83   :  { %v89_v10 = vpop.f32.mrf.mxu0 }
  0x84   :  { %v90_v24 = vadd.f32 %v89_v10, %v40_v13  ;;  %v116_v43 = vpop.permute.xlu0 %115 }
  0x86   :  { %v99_v29 = vmax.f32 %v90_v24, 0.0  ;;  %v121_v37 = vpop.permute.xlu1 %120 }
  0x8b   :  { %v91_v12 = vpop.f32.mrf.mxu0 }
  0x8c   :  { %v92_v22 = vadd.f32 %v91_v12, %v45_v18 }
  0x8e   :  { %v100_v27 = vmax.f32 %v92_v22, 0.0 }
  0x90   :  { %v107_v30 = vpack.c.bf16 %v100_v27, %v99_v29 }
  0x93   :  { %v94_v16 = vpop.f32.mrf.mxu0 }
  0x94   :  { %v95_v19 = vadd.f32 %v94_v16, %v50_v15 }
  0x96   :  { %v101_v25 = vmax.f32 %v95_v19, 0.0 }
  0x9b   :  { %v96_v21 = vpop.f32.mrf.mxu0 }
  0x9c   :  { %v97_v23 = vadd.f32 %v96_v21, %v55_v20 }
  0x9e   :  { %v102_v26 = vmax.f32 %v97_v23, 0.0 }
  0xa0   :  { %v108_v28 = vpack.c.bf16 %v102_v26, %v101_v25 }
  0xa2   :  { %156 = vmatpush.bf16.msra.mxu1 %v108_v28  ;;  %233 = vmatpush.bf16.msra.mxu3 %v108_v28 }
  0xa6   :  { %157 = vmatpush.bf16.msra.mxu1 %v107_v30  ;;  %234 = vmatpush.bf16.msra.mxu3 %v107_v30 }
  0xa9   :  { %225 = vmatmul.msk.bf16.vlgmr.msra.gmra.mxu1 %vm143_vm1, %v231_v31  ;;  %226 = vmatmul.msk.bf16.vlgmr.msra.gmra.mxu3 %vm143_vm1, %v232_v32 }
 0x126   :  { %v159_v33 = vpop.f32.mrf.mxu1 }
 0x127   :  { %v160_v44 = vadd.f32 %v159_v33, %v116_v43 }
 0x129   :  { %v169_v49 = vmax.f32 %v160_v44, 0.0 }
 0x12c   :  { %v164_v35 = vpop.f32.mrf.mxu3 }
 0x12d   :  { %v165_v38 = vadd.f32 %v164_v35, %v126_v34 }
 0x12e   :  { %v161_v36 = vpop.f32.mrf.mxu1 }
 0x12f   :  { %v162_v41 = vadd.f32 %v161_v36, %v121_v37  ;;  %v171_v45 = vmax.f32 %v165_v38, 0.0 }
 0x131   :  { %v170_v47 = vmax.f32 %v162_v41, 0.0 }
 0x133   :  { %v174_v50 = vpack.c.bf16 %v170_v47, %v169_v49 }
 0x134   :  { %v166_v40 = vpop.f32.mrf.mxu3 }
 0x135   :  { %v167_v42 = vadd.f32 %v166_v40, %v131_v39 }
 0x137   :  { %v172_v46 = vmax.f32 %v167_v42, 0.0 }
 0x139   :  { %v175_v48 = vpack.c.bf16 %v172_v46, %v171_v45 }
 0x13b   :  { %191 = vmatpush.bf16.msra.mxu2 %v175_v48 }
 0x13f   :  { %192 = vmatpush.bf16.msra.mxu2 %v174_v50 }
 0x142   :  { %227 = vmatmul.msk.bf16.vlgmr.msra.gmra.mxu2 %vm143_vm1, %v173_v51 }
 0x1c5   :  { %v194_v53 = vpop.f32.mrf.mxu2 }
 0x1c6   :  { %v195_v54 = vadd.f32 %v194_v53, %v180_v52 }
 0x1c8   :  { %198 = vst [vmem:[%s338_s7] sm:$0xf] %v195_v54 }
 0x1cd   :  { %v196_v55 = vpop.f32.mrf.mxu2 }

</bundles_post_ra>
